<compile_context>
chip_gen: v7x
topology: tpu7x:2x2x1
jax: 0.10.0
libtpu: 0.0.40
codegen_flags: <defaults>
</compile_context>

<pallas_src>
import jax
import jax.numpy as jnp
from jax.experimental import pallas as pl
from jax.experimental.pallas import tpu as pltpu


def sfm_kernel(rgb_ref, dep_ref, wd_ref, sd_ref, bd_ref,
               wu_ref, su_ref, bu_ref, out_ref):
    rgb = rgb_ref[...]                                    # (bn, C, HW)
    dep = dep_ref[...]                                    # (bn, C, HW)
    s = rgb + dep

    # Global average pool over spatial (lanes) -> (bn, C).  Accumulate in f32.
    pooled = jnp.mean(s.astype(jnp.float32), axis=-1)

    # down: 1x1 conv (no bias) + folded BN + ReLU6
    h = jnp.dot(pooled, wd_ref[...],
                preferred_element_type=jnp.float32)       # (bn, C//2)
    h = jnp.clip(h * sd_ref[...] + bd_ref[...], 0.0, 6.0)

    # up: 1x1 conv (bias folded into shift) + folded BN + sigmoid
    g = jnp.dot(h, wu_ref[...],
                preferred_element_type=jnp.float32)       # (bn, C)
    logit = jax.nn.sigmoid(g * su_ref[...] + bu_ref[...]).astype(rgb.dtype)

    # out = rgb + dep * logit  (per-channel gate lane-broadcast over HW)
    out_ref[...] = rgb + dep * logit[:, :, None]


def _batch_tile(N, C, HW, itemsize):
    """Pick how many batches to process per grid step."""
    # Per-batch live VMEM: rgb + dep + out, each double-buffered.
    per_batch = 6 * C * HW * itemsize
    budget = 12 << 20        # stays under default scoped VMEM on v5e/v6e/v7x
    bn = max(1, min(N, budget // max(per_batch, 1)))
    # Keep at least two grid steps when N >= 2 so the batch axis (marked
    # "parallel") can be split across v7x's two TensorCores.
    if N >= 2:
        bn = min(bn, pl.cdiv(N, 2))
    return bn


def sfm_forward(rgb_nchw, dep_nchw, params):
    N, C, H, W = rgb_nchw.shape
    HW = H * W
    Ch = C // 2
    wd_t, sd, bd, wu_t, su, bu = params

    # NCHW -> (N, C, HW): pure reshape, no data movement.
    rgb = rgb_nchw.reshape(N, C, HW)
    dep = dep_nchw.reshape(N, C, HW)

    bn = _batch_tile(N, C, HW, rgb.dtype.itemsize)
    grid = (pl.cdiv(N, bn),)

    data_spec = pl.BlockSpec((bn, C, HW), lambda i: (i, 0, 0))
    const2 = lambda i: (0, 0)   # tiny parameter tensors, resident each step

    out = pl.pallas_call(
        sfm_kernel,
        out_shape=jax.ShapeDtypeStruct((N, C, HW), rgb.dtype),
        grid=grid,
        in_specs=[
            data_spec,                               # rgb  (bn, C, HW)
            data_spec,                               # dep  (bn, C, HW)
            pl.BlockSpec((C, Ch), const2),           # down conv weight (C, C//2)
            pl.BlockSpec((1, Ch), const2),           # down BN scale
            pl.BlockSpec((1, Ch), const2),           # down BN shift
            pl.BlockSpec((Ch, C), const2),           # up conv weight (C//2, C)
            pl.BlockSpec((1, C), const2),            # up BN scale
            pl.BlockSpec((1, C), const2),            # up BN shift (+ conv bias)
        ],
        out_specs=data_spec,
        compiler_params=pltpu.CompilerParams(
            dimension_semantics=("parallel",)),
    )(rgb, dep, wd_t, sd, bd, wu_t, su, bu)

    # (N, C, HW) -> NCHW: also a pure reshape.
    return out.reshape(N, C, H, W)


def init_params(key, C, dtype=jnp.float32):
    """Deterministic synthetic parameters; BN (eval mode) folded to scale/shift."""
    Ch = C // 2
    eps = 1e-5
    ks = jax.random.split(key, 11)

    # down: Conv2d(C, C//2, k=1, bias=False), BatchNorm2d(C//2)
    w_down = 0.1 * jax.random.normal(ks[0], (Ch, C), dtype)
    gamma_d = 1.0 + 0.1 * jax.random.normal(ks[1], (Ch,), dtype)
    beta_d = 0.1 * jax.random.normal(ks[2], (Ch,), dtype)
    mean_d = 0.05 * jax.random.normal(ks[3], (Ch,), dtype)
    var_d = jnp.abs(jax.random.normal(ks[4], (Ch,), dtype)) + 0.5

    # up: Conv2d(C//2, C, k=1, bias=True), BatchNorm2d(C)
    w_up = 0.1 * jax.random.normal(ks[5], (C, Ch), dtype)
    bias_up = 0.1 * jax.random.normal(ks[6], (C,), dtype)
    gamma_u = 1.0 + 0.1 * jax.random.normal(ks[7], (C,), dtype)
    beta_u = 0.1 * jax.random.normal(ks[8], (C,), dtype)
    mean_u = 0.05 * jax.random.normal(ks[9], (C,), dtype)
    var_u = jnp.abs(jax.random.normal(ks[10], (C,), dtype)) + 0.5

    scale_d = gamma_d / jnp.sqrt(var_d + eps)
    shift_d = beta_d - mean_d * scale_d
    scale_u = gamma_u / jnp.sqrt(var_u + eps)
    shift_u = beta_u - mean_u * scale_u
    # BN(conv(x) + bias) = scale*(y + bias) + shift  ->  fold bias into shift
    shift_u_eff = scale_u * bias_up + shift_u

    return (
        w_down.T,                       # (C, C//2)
        scale_d.reshape(1, Ch),
        shift_d.reshape(1, Ch),
        w_up.T,                         # (C//2, C)
        scale_u.reshape(1, C),
        shift_u_eff.reshape(1, C),
    )


def sfm_reference(rgb_nchw, dep_nchw, params):
    """Pure-JAX reference with identical (folded) parameters."""
    wd_t, sd, bd, wu_t, su, bu = params
    s = rgb_nchw + dep_nchw
    pooled = jnp.mean(s, axis=(2, 3))                        # (N, C)
    h = jnp.clip((pooled @ wd_t) * sd + bd, 0.0, 6.0)        # (N, C//2)
    logit = jax.nn.sigmoid((h @ wu_t) * su + bu)             # (N, C)
    return rgb_nchw + dep_nchw * logit[:, :, None, None]


if __name__ == "__main__":
    N, C, H, W = 2, 64, 16, 16
    key = jax.random.PRNGKey(0)
    k_rgb, k_dep, k_par = jax.random.split(key, 3)

    rgb = jax.random.normal(k_rgb, (N, C, H, W), jnp.float32)
    dep = jax.random.normal(k_dep, (N, C, H, W), jnp.float32)
    params = init_params(k_par, C)

    out = sfm_forward(rgb, dep, params)
    out = jax.block_until_ready(out)

    ref = sfm_reference(rgb, dep, params)
    assert out.shape == (N, C, H, W)
    assert jnp.allclose(out, ref, atol=1e-5, rtol=1e-5), "mismatch vs reference"

    print("KERNEL_OK")
</pallas_src>

<mosaic_0001>
module attributes {stable_mosaic.version = 11 : i64} {
  func.func @sfm_kernel(%arg0: i32, %arg1: memref<1x64x256xf32, #tpu.memory_space<vmem>>, %arg2: memref<1x64x256xf32, #tpu.memory_space<vmem>>, %arg3: memref<64x32xf32, #tpu.memory_space<vmem>>, %arg4: memref<1x32xf32, #tpu.memory_space<vmem>>, %arg5: memref<1x32xf32, #tpu.memory_space<vmem>>, %arg6: memref<32x64xf32, #tpu.memory_space<vmem>>, %arg7: memref<1x64xf32, #tpu.memory_space<vmem>>, %arg8: memref<1x64xf32, #tpu.memory_space<vmem>>, %arg9: memref<1x64x256xf32, #tpu.memory_space<vmem>>) attributes {dimension_semantics = [#tpu.dimension_semantics<parallel>], iteration_bounds = array<i64: 2>, scalar_prefetch = 0 : i64, scratch_operands = 0 : i64, tpu.core_type = #tpu.core_type<tc>, window_params = [{transform_indices = @transform_0, window_bounds = array<i64: 1, 64, 256>}, {transform_indices = @transform_1, window_bounds = array<i64: 1, 64, 256>}, {pipeline_mode = #tpu.pipeline_mode<synchronous>, transform_indices = @transform_2, window_bounds = array<i64: 64, 32>}, {pipeline_mode = #tpu.pipeline_mode<synchronous>, transform_indices = @transform_3, window_bounds = array<i64: 1, 32>}, {pipeline_mode = #tpu.pipeline_mode<synchronous>, transform_indices = @transform_4, window_bounds = array<i64: 1, 32>}, {pipeline_mode = #tpu.pipeline_mode<synchronous>, transform_indices = @transform_5, window_bounds = array<i64: 32, 64>}, {pipeline_mode = #tpu.pipeline_mode<synchronous>, transform_indices = @transform_6, window_bounds = array<i64: 1, 64>}, {pipeline_mode = #tpu.pipeline_mode<synchronous>, transform_indices = @transform_7, window_bounds = array<i64: 1, 64>}, {transform_indices = @transform_8, window_bounds = array<i64: 1, 64, 256>}]} {
    %c0 = arith.constant 0 : index
    %c0_0 = arith.constant 0 : index
    %c0_1 = arith.constant 0 : index
    %0 = vector.load %arg1[%c0, %c0_0, %c0_1] : memref<1x64x256xf32, #tpu.memory_space<vmem>>, vector<1x64x256xf32>
    %c0_2 = arith.constant 0 : index
    %c0_3 = arith.constant 0 : index
    %c0_4 = arith.constant 0 : index
    %1 = vector.load %arg2[%c0_2, %c0_3, %c0_4] : memref<1x64x256xf32, #tpu.memory_space<vmem>>, vector<1x64x256xf32>
    %2 = arith.addf %0, %1 : vector<1x64x256xf32>
    %cst = arith.constant dense<0.000000e+00> : vector<1x64xf32>
    %3 = vector.multi_reduction <add>, %2, %cst [2] : vector<1x64x256xf32> to vector<1x64xf32>
    %cst_5 = arith.constant 2.560000e+02 : f32
    %4 = vector.broadcast %cst_5 : f32 to vector<1x64xf32>
    %5 = arith.divf %3, %4 : vector<1x64xf32>
    %c0_6 = arith.constant 0 : index
    %c0_7 = arith.constant 0 : index
    %6 = vector.load %arg3[%c0_6, %c0_7] : memref<64x32xf32, #tpu.memory_space<vmem>>, vector<64x32xf32>
    %cst_8 = arith.constant dense<0.000000e+00> : vector<1x32xf32>
    %7 = tpu.matmul %5, %6, %cst_8 {dimension_numbers = #tpu.dot_dimension_numbers<[1], [0], [0], [1], [0, 0, 1, 1], [], []>} : vector<1x64xf32>, vector<64x32xf32>, vector<1x32xf32> -> vector<1x32xf32>
    %c0_9 = arith.constant 0 : index
    %c0_10 = arith.constant 0 : index
    %8 = vector.load %arg4[%c0_9, %c0_10] : memref<1x32xf32, #tpu.memory_space<vmem>>, vector<1x32xf32>
    %9 = arith.mulf %7, %8 : vector<1x32xf32>
    %c0_11 = arith.constant 0 : index
    %c0_12 = arith.constant 0 : index
    %10 = vector.load %arg5[%c0_11, %c0_12] : memref<1x32xf32, #tpu.memory_space<vmem>>, vector<1x32xf32>
    %11 = arith.addf %9, %10 : vector<1x32xf32>
    %cst_13 = arith.constant 0.000000e+00 : f32
    %cst_14 = arith.constant 6.000000e+00 : f32
    %12 = vector.broadcast %cst_13 : f32 to vector<1x32xf32>
    %13 = arith.maximumf %12, %11 : vector<1x32xf32>
    %14 = vector.broadcast %cst_14 : f32 to vector<1x32xf32>
    %15 = arith.minimumf %14, %13 : vector<1x32xf32>
    %c0_15 = arith.constant 0 : index
    %c0_16 = arith.constant 0 : index
    %16 = vector.load %arg6[%c0_15, %c0_16] : memref<32x64xf32, #tpu.memory_space<vmem>>, vector<32x64xf32>
    %cst_17 = arith.constant dense<0.000000e+00> : vector<1x64xf32>
    %17 = tpu.matmul %15, %16, %cst_17 {dimension_numbers = #tpu.dot_dimension_numbers<[1], [0], [0], [1], [0, 0, 1, 1], [], []>} : vector<1x32xf32>, vector<32x64xf32>, vector<1x64xf32> -> vector<1x64xf32>
    %c0_18 = arith.constant 0 : index
    %c0_19 = arith.constant 0 : index
    %18 = vector.load %arg7[%c0_18, %c0_19] : memref<1x64xf32, #tpu.memory_space<vmem>>, vector<1x64xf32>
    %19 = arith.mulf %17, %18 : vector<1x64xf32>
    %c0_20 = arith.constant 0 : index
    %c0_21 = arith.constant 0 : index
    %20 = vector.load %arg8[%c0_20, %c0_21] : memref<1x64xf32, #tpu.memory_space<vmem>>, vector<1x64xf32>
    %21 = arith.addf %19, %20 : vector<1x64xf32>
    %22 = arith.negf %21 : vector<1x64xf32>
    %23 = math.exp %22 : vector<1x64xf32>
    %cst_22 = arith.constant 1.000000e+00 : f32
    %24 = vector.broadcast %cst_22 : f32 to vector<1x64xf32>
    %25 = arith.addf %24, %23 : vector<1x64xf32>
    %26 = arith.divf %24, %25 : vector<1x64xf32>
    %27 = vector.shape_cast %26 : vector<1x64xf32> to vector<1x64x1xf32>
    %28 = vector.broadcast %27 : vector<1x64x1xf32> to vector<1x64x256xf32>
    %29 = arith.mulf %1, %28 : vector<1x64x256xf32>
    %30 = arith.addf %0, %29 : vector<1x64x256xf32>
    %c0_23 = arith.constant 0 : index
    %c0_24 = arith.constant 0 : index
    %c0_25 = arith.constant 0 : index
    %31 = vector.load %arg9[%c0_23, %c0_24, %c0_25] : memref<1x64x256xf32, #tpu.memory_space<vmem>>, vector<1x64x256xf32>
    tpu.vector_store %arg9[%c0_23, %c0_24, %c0_25], %30 {strides = array<i32>} : memref<1x64x256xf32, #tpu.memory_space<vmem>>, vector<1x64x256xf32>,
    return
  }
  func.func @transform_0(%arg0: i32) -> (i32, i32, i32) {
    %c0_i32 = arith.constant 0 : i32
    %c0_i32_0 = arith.constant 0 : i32
    %c0_i32_1 = arith.constant 0 : i32
    return %arg0, %c0_i32, %c0_i32_0 : i32, i32, i32
  }
  func.func @transform_1(%arg0: i32) -> (i32, i32, i32) {
    %c0_i32 = arith.constant 0 : i32
    %c0_i32_0 = arith.constant 0 : i32
    %c0_i32_1 = arith.constant 0 : i32
    return %arg0, %c0_i32, %c0_i32_0 : i32, i32, i32
  }
  func.func @transform_2(%arg0: i32) -> (i32, i32) {
    %c0_i32 = arith.constant 0 : i32
    %c0_i32_0 = arith.constant 0 : i32
    %c0_i32_1 = arith.constant 0 : i32
    return %c0_i32, %c0_i32_0 : i32, i32
  }
  func.func @transform_3(%arg0: i32) -> (i32, i32) {
    %c0_i32 = arith.constant 0 : i32
    %c0_i32_0 = arith.constant 0 : i32
    %c0_i32_1 = arith.constant 0 : i32
    return %c0_i32, %c0_i32_0 : i32, i32
  }
  func.func @transform_4(%arg0: i32) -> (i32, i32) {
    %c0_i32 = arith.constant 0 : i32
    %c0_i32_0 = arith.constant 0 : i32
    %c0_i32_1 = arith.constant 0 : i32
    return %c0_i32, %c0_i32_0 : i32, i32
  }
  func.func @transform_5(%arg0: i32) -> (i32, i32) {
    %c0_i32 = arith.constant 0 : i32
    %c0_i32_0 = arith.constant 0 : i32
    %c0_i32_1 = arith.constant 0 : i32
    return %c0_i32, %c0_i32_0 : i32, i32
  }
  func.func @transform_6(%arg0: i32) -> (i32, i32) {
    %c0_i32 = arith.constant 0 : i32
    %c0_i32_0 = arith.constant 0 : i32
    %c0_i32_1 = arith.constant 0 : i32
    return %c0_i32, %c0_i32_0 : i32, i32
  }
  func.func @transform_7(%arg0: i32) -> (i32, i32) {
    %c0_i32 = arith.constant 0 : i32
    %c0_i32_0 = arith.constant 0 : i32
    %c0_i32_1 = arith.constant 0 : i32
    return %c0_i32, %c0_i32_0 : i32, i32
  }
  func.func @transform_8(%arg0: i32) -> (i32, i32, i32) {
    %c0_i32 = arith.constant 0 : i32
    %c0_i32_0 = arith.constant 0 : i32
    %c0_i32_1 = arith.constant 0 : i32
    return %arg0, %c0_i32, %c0_i32_0 : i32, i32, i32
  }
}

</mosaic_0001>

<bundles_post_ra>
// kernel: tpu_custom_call.1
= control target key start
LH: loop header
LB: loop body
LE: loop exit
PB: predicated region body
PF: predicated region fallthrough
CT: control target
= control target key end

     0   :  { %s1688_s0 = inlined_call_operand.hbm [shape: f32[2,64,256], index: 0, kind: input, shape index: {}]   ;;  %s1689_s1 = inlined_call_operand.hbm [shape: f32[2,64,256], index: 1, kind: input, shape index: {}]   ;;  %s1690_s2 = inlined_call_operand.vmem [shape: f32[64,32], index: 2, kind: input, shape index: {}]   ;;  %s1691_s3 = inlined_call_operand.vmem [shape: f32[1,32], index: 3, kind: input, shape index: {}]   ;;  %s1692_s4 = inlined_call_operand.vmem [shape: f32[1,32], index: 4, kind: input, shape index: {}]   ;;  %s1693_s5 = inlined_call_operand.vmem [shape: f32[32,64], index: 5, kind: input, shape index: {}]   ;;  %s1694_s6 = inlined_call_operand.vmem [shape: f32[1,64], index: 6, kind: input, shape index: {}]   ;;  %s1695_s7 = inlined_call_operand.vmem [shape: f32[1,64], index: 7, kind: input, shape index: {}]   ;;  %s1696_s8 = inlined_call_operand.hbm [shape: f32[2,64,256], index: 8, kind: output, shape index: {}]  }
   0x1   :  { %1703 = sst [smem:[#allocation13_spill]] %s1688_s0 }
   0x2   :  { %13 = vsyncpa [#allocation3], 0 }
   0x3   :  { %15 = vsyncpa [#allocation3 + $0x1], 0 }
   0x4   :  { %16 = vsyncpa [#allocation6], 0 }
   0x5   :  { %18 = vsyncpa [#allocation6 + $0x1], 0 }
   0x6   :  { %19 = vsyncpa [#allocation4], 0 }
   0x7   :  { %21 = vsyncpa [#allocation4 + $0x1], 0  ;;  %s1211_s27 = smov 0   ;;  %s1213_s28 = smov 0  }
   0x8   :  { %s1215_s29 = smov 0   ;;  %s1217_s30 = smov 0  }
   0x9 LB: > { %1704 = sst [smem:[#allocation11_spill]] %s1150_s29  ;;  %s1232_s9 = sadd.s32 4294967295, %s1154_s30   ;;  %s1154_s30 = sphi %s1217_s30, %s1724_s30   ;;  %s1150_s29 = sphi %s1215_s29, %s1721_s29   ;;  %s1146_s28 = sphi %s1213_s28, %s1723_s28   ;;  %s1142_s27 = sphi %s1211_s27, %s1722_s27  }
   0xa   : > { %s876_s10 = sadd.s32 4294967294, %s1154_s30   ;;  %s1236_s11 = sadd.s32 1, %s1154_s30  }
   0xb   : > { %s34_s12 = sadd.s32 1, %s1150_s29  ;;  %s31_s13 = ssub.s32 %s1154_s30, %s1236_s11 }
   0xc   : > { %p41_p0 = scmp.ne.s32.totalorder %s1150_s29, %s1146_s28  ;;  %p32_p1 = scmp.eq.s32.totalorder %s31_s13, 0 }
   0xd   : > { %p42_p2 = scmp.eq.s32.totalorder %s1154_s30, 0  ;;  %p47_p3 = scmp.ne.s32.totalorder %s1146_s28, %s1142_s27 }
   0xe   : > { %p48_p4 = scmp.eq.s32.totalorder %s1232_s9, 0  ;;  %p223_p7 = scmp.eq.s32.totalorder %s1232_s9, 1 }
   0xf   : > { %s1248_s14 = scalar_select %p32_p1, %s1150_s29, %s34_s12  }
  0x10   : > { %p1250_p5 = por %p42_p2, %p41_p0  ;;  %p1254_p6 = por %p48_p4, %p47_p3 }
  0x11   : > { %1705 = sst [smem:[#allocation12_spill]] %s1248_s14  ;;  %p229_p8 = scmp.eq.s32.totalorder %s876_s10, 1 }
  0x12   : > { %s1707_s16 = scalar_select %p1254_p6, 1, 0 }
  0x13   : > { %p979_p10 = scmp.lt.s32.totalorder %s1154_s30, 2  ;;  %p1261_p11 = por %p223_p7, %p41_p0 }
  0x14   : > { %p1265_p12 = por %p229_p8, %p47_p3  ;;  %s1270_s19 = sand.u32 1, %s1150_s29  }
  0x15   : > { %s1708_s17 = scalar_select %p1261_p11, 1, 0 }
  0x16   : > { %s1709_s18 = scalar_select %p1265_p12, 1, 0 }
  0x17   : > { %s1698_s20 = sshll.u32 %s1154_s30, 11  ;;  %s1697_s21 = sshll.u32 %s1270_s19, 7 }
  0x18   : > { %s1710_s0 = sld [smem:[#allocation13_spill]]  ;;  %s271_s25 = scalar_lea.vmem [#allocation2], %s1697_s21 }
  0x19   : > { %s278_s26 = sshll.u32 %s271_s25, 4  ;;  %p1285_p13 = pnand %p979_p10, %p1250_p5  ;;  %s1289_s26 = int_to_ptr.vmem [resolvable:$true] %s278_s26 }
  0x1a   : > { %s268_s12 = scalar_lea.sflag [#allocation3], %s1270_s19 }
  0x1b   : > { %p1026_p1 = pneg %p1285_p13 }
  0x1e   : > { %s1279_s24 = scalar_lea.hbm %s1710_s0, %s1698_s20  ;;  %s1029_s15 = scalar_lea.hbm %s1710_s0, 4096 }
  0x1f   : > { %s1024_s13 = scalar_lea.hbm %s1279_s24, 2048  ;;  %p1030_p4 = scmp.lt.u32.totalorder %s1279_s24, %s1710_s0 }
  0x20   : > { %p1025_p0 = scmp.ne.s32.totalorder %s1279_s24, %s1024_s13  ;;  %p1031_p5 = scmp.lt.u32.totalorder %s1029_s15, %s1024_s13 }
  0x21   : > { %p1033_p8 = scmp.lt.u32.totalorder %s1024_s13, %s1279_s24 }
  0x22   : > { %p1027_p2 = pnand %p1026_p1, %p1025_p0  ;;  %p1032_p7 = por %p1031_p5, %p1030_p4 }
  0x24   : > { %p1028_p3 = pneg %p1027_p2  ;;  %p1034_p10 = por %p1033_p8, %p1032_p7 }
  0x26   : > { %p1035_p9 = pnand %p1034_p10, %p1028_p3 }
  0x28   : > { %1038 = shalt.err (!%p1035_p9)
}
  0x29   : > { %s1039_s20 = scalar_lea.vmem %s1289_s26, 2048  ;;  %s1156_s22 = smov [#allocation2]  }
  0x2a   : > { %p1040_p0 = scmp.ne.s32.totalorder %s1289_s26, %s1039_s20  ;;  %s1044_s23 = sshll.u32 %s1156_s22, 4  ;;  %s1045_s23 = int_to_ptr.vmem [resolvable:$false] %s1044_s23 }
  0x2b   : > { %s1046_s21 = scalar_lea.vmem %s1045_s23, 4096  ;;  %p1047_p11 = scmp.lt.s32.totalorder %s1289_s26, %s1045_s23 }
  0x2c   : > { %p1042_p2 = pnand %p1040_p0, %p1026_p1  ;;  %p1048_p4 = scmp.lt.s32.totalorder %s1046_s21, %s1039_s20 }
  0x2e   : > { %p1043_p12 = pneg %p1042_p2  ;;  %p1049_p5 = por %p1048_p4, %p1047_p11 }
  0x30   : > { %p1050_p7 = pnand %p1049_p5, %p1043_p12 }
  0x32   : > { %1053 = shalt.err (!%p1050_p7)
}
  0x33   : > { %s1701_s13 = smov 256   ;;  %s1158_s15 = smov 16  }
  0x34   : > { %971 = dma.hbm_to_vmem [thread:$0]  (!%p1285_p13), %s1279_s24, 2048, %s1289_s26, %s268_s12, %s1701_s13, %s1701_s13, %s1158_s15  }
  0x35   : > { %p885_p9 = scmp.ge.s32.totalorder %s1154_s30, 1  ;;  %p307_p11 = scmp.lt.s32.totalorder %s1154_s30, 3 }
  0x36   : > { %s1713_s25 = sshll.u32 %s1154_s30, 11  ;;  %s1714_s0 = sshll.u32 %s1270_s19, 7 }
  0x37   : > { %p1324_p12 = pnand %p885_p9, %p307_p11  ;;  %s1333_s21 = scalar_lea.hbm %s1689_s1, %s1713_s25 }
  0x38   : > { %s292_s14 = scalar_lea.vmem [#allocation5], %s1714_s0  ;;  %s289_s24 = scalar_lea.sflag [#allocation6], %s1270_s19 }
  0x39   : > { %s299_s29 = sshll.u32 %s292_s14, 4  ;;  %s1054_s26 = scalar_lea.hbm %s1333_s21, 2048  ;;  %s1337_s29 = int_to_ptr.vmem [resolvable:$true] %s299_s29 }
  0x3a   : > { %p1055_p3 = scmp.ne.s32.totalorder %s1333_s21, %s1054_s26  ;;  %s1059_s25 = scalar_lea.hbm %s1689_s1, 4096 }
  0x3b   : > { %p1060_p0 = scmp.lt.u32.totalorder %s1333_s21, %s1689_s1  ;;  %p1061_p2 = scmp.lt.u32.totalorder %s1059_s25, %s1054_s26 }
  0x3c   : > { %p1057_p8 = pnand %p1055_p3, %p1026_p1  ;;  %p1063_p5 = scmp.lt.u32.totalorder %s1054_s26, %s1333_s21 }
  0x3d   : > { %p1062_p4 = por %p1061_p2, %p1060_p0 }
  0x3e   : > { %p1058_p10 = pneg %p1057_p8 }
  0x3f   : > { %p1064_p7 = por %p1063_p5, %p1062_p4 }
  0x41   : > { %p1065_p9 = pnand %p1064_p7, %p1058_p10 }
  0x43   : > { %1068 = shalt.err (!%p1065_p9)
}
  0x44   : > { %s1069_s0 = scalar_lea.vmem %s1337_s29, 2048  ;;  %s1159_s14 = smov [#allocation5]  }
  0x45   : > { %p1070_p11 = scmp.ne.s32.totalorder %s1337_s29, %s1069_s0  ;;  %s1074_s12 = sshll.u32 %s1159_s14, 4  ;;  %s1075_s12 = int_to_ptr.vmem [resolvable:$false] %s1074_s12 }
  0x46   : > { %s1076_s13 = scalar_lea.vmem %s1075_s12, 4096  ;;  %p1077_p6 = scmp.lt.s32.totalorder %s1337_s29, %s1075_s12 }
  0x47   : > { %p1072_p3 = pnand %p1070_p11, %p1026_p1  ;;  %p1078_p0 = scmp.lt.s32.totalorder %s1076_s13, %s1069_s0 }
  0x49   : > { %p1073_p8 = pneg %p1072_p3  ;;  %p1079_p2 = por %p1078_p0, %p1077_p6 }
  0x4b   : > { %p1080_p4 = pnand %p1079_p2, %p1073_p8 }
  0x4d   : > { %1083 = shalt.err (!%p1080_p4)
}
  0x4e   : > { %s1715_s26 = smov 256   ;;  %311 = sbr.rel (%p1324_p12) target bundleno = 869 (0x365), region = 52 }
  0x4f   : > { %974 = dma.hbm_to_vmem [thread:$0]  (!%p1285_p13), %s1333_s21, 2048, %s1337_s29, %s289_s24, %s1715_s26, %s1715_s26, %s1158_s15  }
  0x50   : > { %s1371_s22 = sand.u32 (!%p1324_p12), 1, %s1146_s28   ;;  %p1716_p6 = scmp.ne.s32.totalorder (!%p1324_p12), %s1707_s16, 0 }
  0x51   : > { %s1374_s25 = sshll.u32 (!%p1324_p12), %s1371_s22, 7  ;;  %s314_s10 = scalar_lea.sflag (!%p1324_p12), [#allocation3], %s1371_s22 }
  0x52   : > { %s1378_s23 = scalar_lea.vmem (!%p1324_p12), [#allocation2], %s1374_s25 }
  0x55   : > { %1129 = dma.done.wait (%p1716_p6), %s314_s10, 2048  }
  0x56   : > { %1131 = vsyncadd (%p1716_p6), %s314_s10, 4294965248  ;;  %s323_s29 = scalar_lea.sflag [#allocation6], %s1371_s22  ;;  %s1386_s19 = scalar_lea.vmem [#allocation5], %s1374_s25 }
  0x57   : > { %1133 = dma.done.wait (%p1716_p6), %s323_s29, 2048  }
  0x58   : > { %1135 = vsyncadd (%p1716_p6), %s323_s29, 4294965248  ;;  %v1393_v0 = vld [vmem:[%s1378_s23] sm:$0xff]  ;;  %v1396_v1 = vld [vmem:[%s1378_s23 + $0x8] sm:$0xff]  ;;  %v1160_v59 = vmov 0.0|0.0   ;;  %vm1161_vm0 = vmmov 0   ;;  %vm472_vm1 = vcmask 130112  }
  0x59   : > { %v1399_v2 = vld [vmem:[%s1386_s19] sm:$0xff]  ;;  %v1402_v3 = vld [vmem:[%s1386_s19 + $0x8] sm:$0xff]  ;;  %v1421_v10 = vld [vmem:[%s1378_s23 + $0x10] sm:$0xff]  ;;  %944 = vmatprep.subr.bf16.mxu0 %v1160_v59  ;;  %956 = vmatprep.subr.bf16.mxu1 %v1160_v59  ;;  %vm479_vm2 = vcmask 195712   ;;  %vm486_vm3 = vcmask 261312   ;;  %vm493_vm4 = vcmask 326912  }
  0x5a   : > { %v396_v4 = vadd.f32 %v1399_v2, %v1393_v0  ;;  %v1407_v5 = vld [vmem:[%s1378_s23 + $0x20] sm:$0xff]  ;;  %v1410_v6 = vld [vmem:[%s1378_s23 + $0x28] sm:$0xff]  ;;  %v397_v7 = vadd.f32 %v1402_v3, %v1396_v1  ;;  %v1428_v13 = vld [vmem:[%s1378_s23 + $0x18] sm:$0xff]  ;;  %vm500_vm5 = vcmask 392512   ;;  %vm507_vm6 = vcmask 458112   ;;  %s1595_s24 = scalar_lea.vmem [#allocation7], %s1374_s25 }
  0x5b   : > { %v1415_v8 = vld [vmem:[%s1386_s19 + $0x20] sm:$0xff]  ;;  %v1418_v9 = vld [vmem:[%s1386_s19 + $0x28] sm:$0xff]  ;;  %v1431_v14 = vld [vmem:[%s1386_s19 + $0x10] sm:$0xff]  ;;  %vm514_vm7 = vcmask 523712   ;;  %vm516_vm8 = vcmask 523264   ;;  %vm599_vm9 = vcmask 261120  }
  0x5c   : > { %v400_v11 = vadd.f32 %v1415_v8, %v1407_v5  ;;  %v401_v12 = vadd.f32 %v1418_v9, %v1410_v6  ;;  %v1434_v15 = vld [vmem:[%s1386_s19 + $0x18] sm:$0xff]  ;;  %v412_v16 = vadd.f32 %v397_v7, %v396_v4  ;;  %v398_v17 = vadd.f32 %v1431_v14, %v1421_v10  ;;  %v1441_v19 = vld [vmem:[%s1378_s23 + $0x30] sm:$0xff]  ;;  %v1455_v25 = vld [vmem:[%s1378_s23 + $0x40] sm:$0xff]  ;;  %s899_s25 = sshll.u32 %s1232_s9, 11  ;;  %s780_s0 = sshll.u32 %s1595_s24, 4  ;;  %s1640_s0 = int_to_ptr.vmem [resolvable:$true] %s780_s0 }
  0x5d   : > { %v399_v18 = vadd.f32 %v1434_v15, %v1428_v13  ;;  %v1444_v20 = vld [vmem:[%s1378_s23 + $0x38] sm:$0xff]  ;;  %v1447_v21 = vld [vmem:[%s1386_s19 + $0x30] sm:$0xff]  ;;  %v1458_v26 = vld [vmem:[%s1378_s23 + $0x48] sm:$0xff]  ;;  %s1638_s13 = scalar_lea.hbm %s1696_s8, %s899_s25  ;;  %s767_s9 = scalar_lea.sflag [#allocation4], %s1371_s22 }
  0x5e   : > { %v418_v22 = vadd.f32 %v401_v12, %v400_v11  ;;  %v1450_v23 = vld [vmem:[%s1386_s19 + $0x38] sm:$0xff]  ;;  %v402_v24 = vadd.f32 %v1447_v21, %v1441_v19  ;;  %413 = vadd.xlane.f32.xlu0 %v412_v16  ;;  %v1463_v29 = vld [vmem:[%s1386_s19 + $0x40] sm:$0xff]  ;;  %v1466_v30 = vld [vmem:[%s1386_s19 + $0x48] sm:$0xff]  ;;  %s1084_s26 = scalar_lea.vmem %s1640_s0, 2048  ;;  %p1717_p1 = scmp.ne.s32.totalorder %s1708_s17, 0 }
  0x5f   : > { %v415_v27 = vadd.f32 %v399_v18, %v398_v17  ;;  %v403_v28 = vadd.f32 %v1450_v23, %v1444_v20  ;;  %v1469_v31 = vld [vmem:[%s1378_s23 + $0x50] sm:$0xff]  ;;  %v404_v32 = vadd.f32 %v1463_v29, %v1455_v25  ;;  %v405_v33 = vadd.f32 %v1466_v30, %v1458_v26  ;;  %v1476_v34 = vld [vmem:[%s1378_s23 + $0x58] sm:$0xff]  ;;  %v1489_v40 = vld [vmem:[%s1378_s23 + $0x60] sm:$0xff]  ;;  %p1085_p13 = scmp.ne.s32.totalorder %s1640_s0, %s1084_s26  ;;  %s1163_s10 = smov [#allocation7]  }
  0x60   : > { %419 = vadd.xlane.f32.xlu1 %v418_v22  ;;  %v1479_v35 = vld [vmem:[%s1386_s19 + $0x50] sm:$0xff]  ;;  %v1482_v36 = vld [vmem:[%s1386_s19 + $0x58] sm:$0xff]  ;;  %v1492_v41 = vld [vmem:[%s1378_s23 + $0x68] sm:$0xff]  ;;  %v1162_v17 = vmov 0.0   ;;  %v461_v18 = vlaneseq }
  0x61   : > { %v421_v37 = vadd.f32 %v403_v28, %v402_v24  ;;  %v406_v38 = vadd.f32 %v1479_v35, %v1469_v31  ;;  %v407_v39 = vadd.f32 %v1482_v36, %v1476_v34  ;;  %v1495_v42 = vld [vmem:[%s1386_s19 + $0x60] sm:$0xff]  ;;  %v1498_v43 = vld [vmem:[%s1386_s19 + $0x68] sm:$0xff]  ;;  %v1501_v44 = vld [vmem:[%s1378_s23 + $0x70] sm:$0xff]  ;;  %v424_v46 = vadd.f32 %v405_v33, %v404_v32  ;;  %930 = vmatprep.mubr.msk.f32.mxu0 %vm1161_vm0, %v1162_v17  ;;  %p1086_p12 = pnand %p1085_p13, %p1717_p1 }
  0x62   : > { %v1504_v45 = vld [vmem:[%s1378_s23 + $0x78] sm:$0xff]  ;;  %416 = vadd.xlane.f32.xlu0 %v415_v27  ;;  %v408_v47 = vadd.f32 %v1495_v42, %v1489_v40  ;;  %v409_v48 = vadd.f32 %v1498_v43, %v1492_v41  ;;  %v1511_v49 = vld [vmem:[%s1386_s19 + $0x70] sm:$0xff]  ;;  %v445_v56 = vld [vmem:[%s1690_s2] sm:$0xff]  ;;  %941 = vmatprep.mubr.msk.f32.mxu1 %vm1161_vm0, %v1162_v17  ;;  %v462_v22 = vand.u32 127, %v461_v18  ;;  %v1549_v24 = vshrl.u32 %v461_v18, 7  ;;  %s1088_s23 = sshll.u32 %s1163_s10, 4  ;;  %s1089_s23 = int_to_ptr.vmem [resolvable:$false] %s1088_s23 }
  0x63   : > { %v1514_v50 = vld [vmem:[%s1386_s19 + $0x78] sm:$0xff]  ;;  %v427_v51 = vadd.f32 %v407_v39, %v406_v38  ;;  %v410_v52 = vadd.f32 %v1511_v49, %v1501_v44  ;;  %v446_v57 = vld [vmem:[%s1690_s2 + $0x8] sm:$0xff]  ;;  %v447_v60 = vld [vmem:[%s1690_s2 + $0x10] sm:$0xff]  ;;  %p1087_p10 = pneg %p1086_p12  ;;  %s1090_s29 = scalar_lea.vmem %s1089_s23, 4096 }
  0x64   : > { %422 = vadd.xlane.f32.xlu1 %v421_v37  ;;  %v411_v53 = vadd.f32 %v1514_v50, %v1504_v45  ;;  %v430_v54 = vadd.f32 %v409_v48, %v408_v47  ;;  %v945_v58 = vpack.c.bf16 %v446_v57, %v445_v56  ;;  %v448_v61 = vld [vmem:[%s1690_s2 + $0x18] sm:$0xff]  ;;  %v449_v63 = vld [vmem:[%s1690_s2 + $0x20] sm:$0xff]  ;;  %v450_v4 = vld [vmem:[%s1690_s2 + $0x28] sm:$0xff]  ;;  %v467_v27 = vadd.s32 4294967288, %v462_v22  ;;  %p1091_p5 = scmp.lt.s32.totalorder %s1640_s0, %s1089_s23  ;;  %p1092_p7 = scmp.lt.s32.totalorder %s1090_s29, %s1084_s26 }
  0x65   : > { %v948_v62 = vpack.c.bf16 %v448_v61, %v447_v60  ;;  %v951_v7 = vpack.c.bf16 %v450_v4, %v449_v63  ;;  %v451_v11 = vld [vmem:[%s1690_s2 + $0x30] sm:$0xff]  ;;  %v452_v12 = vld [vmem:[%s1690_s2 + $0x38] sm:$0xff]  ;;  %v474_v32 = vadd.s32 4294967280, %v462_v22  ;;  %v481_v33 = vadd.s32 4294967272, %v462_v22 }
  0x66   : > { %425 = vadd.xlane.f32.xlu0 %v424_v46  ;;  %v433_v55 = vadd.f32 %v411_v53, %v410_v52  ;;  %946 = vmatpush3.bf16.msra.mxu0 %v945_v58  ;;  %v954_v16 = vpack.c.bf16 %v452_v12, %v451_v11  ;;  %v465_v38 = vsub.s32 %v462_v22, %v1549_v24  ;;  %v488_v47 = vadd.s32 4294967264, %v462_v22  ;;  %p1093_p9 = por %p1092_p7, %p1091_p5 }
  0x67   : > { %947 = vmatprep.subr.bf16.mxu0 %v1160_v59  ;;  %v470_v46 = vsub.s32 %v467_v27, %v1549_v24  ;;  %v477_v48 = vsub.s32 %v474_v32, %v1549_v24  ;;  %v484_v53 = vsub.s32 %v481_v33, %v1549_v24  ;;  %v509_v12 = vadd.s32 4294967240, %v462_v22 }
  0x68   : > { %428 = vadd.xlane.f32.xlu1 %v427_v51  ;;  %v491_v61 = vsub.s32 %v488_v47, %v1549_v24  ;;  %p1094_p11 = pnand %p1093_p9, %p1087_p10 }
  0x6a   : > { %431 = vadd.xlane.f32.xlu0 %v430_v54  ;;  %949 = vmatpush3.bf16.msra.mxu0 %v948_v62  ;;  %v495_v54 = vadd.s32 4294967256, %v462_v22  ;;  %v502_v62 = vadd.s32 4294967248, %v462_v22 }
  0x6b   : > { %950 = vmatprep.subr.bf16.mxu0 %v1160_v59 }
  0x6c   : > { %434 = vadd.xlane.f32.xlu1 %v433_v55  ;;  %v498_v11 = vsub.s32 %v495_v54, %v1549_v24 }
  0x6e   : > { %952 = vmatpush3.bf16.msra.mxu0 %v951_v7 }
  0x6f   : > { %953 = vmatprep.subr.bf16.mxu0 %v1160_v59 }
  0x72   : > { %955 = vmatpush3.bf16.msra.mxu0 %v954_v16 }
  0xeb   : > { %v414_v28 = vpop.xlane.xlu0 %413 }
  0xec   : > { %v437_v39 = vmul.f32 0.00390625, %v414_v28 }
  0xed   : > { %v420_v37 = vpop.xlane.xlu1 %419 }
  0xee   : > { %v439_v51 = vmul.f32 0.00390625, %v420_v37  ;;  %v466_v58 = vrot.slane %v437_v39, %v465_v38  ;;  %v505_v37 = vsub.s32 %v502_v62, %v1549_v24  ;;  %v598_v62 = vld [vmem:[%s1693_s5 + $0x18] sm:$0xff] }
  0xef   : > { %v417_v52 = vpop.xlane.xlu0 %416 }
  0xf0   : > { %v438_v55 = vmul.f32 0.00390625, %v417_v52  ;;  %v478_v63 = vrot.slane %v439_v51, %v477_v48 }
  0xf1   : > { %v423_v56 = vpop.xlane.xlu1 %422 }
  0xf2   : > { %v440_v57 = vmul.f32 0.00390625, %v423_v56  ;;  %v471_v60 = vrot.slane %v438_v55, %v470_v46  ;;  %v512_v46 = vsub.s32 %v509_v12, %v1549_v24 }
  0xf3   : > { %v426_v7 = vpop.xlane.xlu0 %425 }
  0xf4   : > { %v485_v4 = vrot.slane %v440_v57, %v484_v53  ;;  %v473_v16 = vsel %vm472_vm1, %v471_v60, %v466_v58  ;;  %v441_v17 = vmul.f32 0.00390625, %v426_v7  ;;  %v595_v57 = vld [vmem:[%s1693_s5] sm:$0xff]  ;;  %v596_v58 = vld [vmem:[%s1693_s5 + $0x8] sm:$0xff] }
  0xf5   : > { %v429_v18 = vpop.xlane.xlu1 %428  ;;  %v480_v27 = vsel %vm479_vm2, %v478_v63, %v473_v16  ;;  %v957_v60 = vpack.c.bf16 %v596_v58, %v595_v57 }
  0xf6   : > { %v442_v28 = vmul.f32 0.00390625, %v429_v18  ;;  %v487_v32 = vsel %vm486_vm3, %v485_v4, %v480_v27  ;;  %v492_v33 = vrot.slane %v441_v17, %v491_v61  ;;  %v597_v61 = vld [vmem:[%s1693_s5 + $0x10] sm:$0xff]  ;;  %v589_v4 = vld [vmem:[%s1691_s3] sm:$0x1] }
  0xf7   : > { %v432_v39 = vpop.xlane.xlu0 %431  ;;  %958 = vmatpush3.bf16.msra.mxu1 %v957_v60  ;;  %v960_v63 = vpack.c.bf16 %v598_v62, %v597_v61  ;;  %v673_v27 = vld [vmem:[%s1694_s6] sm:$0x1] }
  0xf8   : > { %v499_v38 = vrot.slane %v442_v28, %v498_v11  ;;  %v494_v47 = vsel %vm493_vm4, %v492_v33, %v487_v32  ;;  %v443_v48 = vmul.f32 0.00390625, %v432_v39  ;;  %959 = vmatprep.subr.bf16.mxu1 %v1160_v59  ;;  %v591_v11 = vld [vmem:[%s1692_s4] sm:$0x1] }
  0xf9   : > { %v435_v51 = vpop.xlane.xlu1 %434  ;;  %v675_v32 = vld [vmem:[%s1695_s7] sm:$0x1] }
  0xfa   : > { %v444_v22 = vmul.f32 0.00390625, %v435_v51  ;;  %v506_v52 = vrot.slane %v443_v48, %v505_v37  ;;  %v501_v53 = vsel %vm500_vm5, %v499_v38, %v494_v47  ;;  %v685_v48 = vsub.s32 0, %v1549_v24 }
  0xfb   : > { %961 = vmatpush3.bf16.msra.mxu1 %v960_v63 }
  0xfc   : > { %v513_v54 = vrot.slane %v444_v22, %v512_v46  ;;  %v508_v55 = vsel %vm507_vm6, %v506_v52, %v501_v53 }
  0xfe   : > { %v515_v56 = vsel %vm514_vm7, %v513_v54, %v508_v55 }
  0xff   : > { %931 = vmatmul.mubr.msk.f32.vlgmr.msra.gmra.mrb[0].mxu0 %vm516_vm8, %v515_v56 }
 0x1d2   : > { %v585_v7 = vpop.f32.mrb[0].mxu0 }
 0x1d3   : > { %v590_v59 = vmul.f32 %v589_v4, %v585_v7  ;;  %v932_v12 = vpop.f32.mrb[1].mxu0 }
 0x1d5   : > { %v592_v16 = vadd.f32 %v591_v11, %v590_v59 }
 0x1d7   : > { %v593_v17 = vmax.f32 %v592_v16, 0.0 }
 0x1d9   : > { %v594_v18 = vmin.f32 %v593_v17, 6.0 }
 0x1db   : > { %942 = vmatmul.mubr.msk.f32.vlgmr.msra.gmra.mrb[0].mxu1 %vm599_vm9, %v594_v18 }
 0x2ae   : > { %v669_v28 = vpop.f32.mrb[0].mxu1 }
 0x2af   : > { %v674_v33 = vmul.f32 %v673_v27, %v669_v28  ;;  %v943_v37 = vpop.f32.mrb[1].mxu1 }
 0x2b1   : > { %v676_v38 = vadd.f32 %v675_v32, %v674_v33 }
 0x2b3   : > { %v891_v39 = vmul.f32 -1.442695, %v676_v38 }
 0x2b5   : > { %1020 = vpow2.f32 %v891_v39 }
 0x2bf   : > { %v1021_v46 = vpop.eup %1020 }
 0x2c0   : > { %v680_v47 = vadd.f32 1.0, %v1021_v46 }
 0x2c2   : > { %1022 = vrcp.f32 %v680_v47 }
 0x2cc   : > { %v1023_v51 = vpop.eup %1022 }
 0x2cd   : > { %v686_v22 = vrot.slane %v1023_v51, %v685_v48 }
 0x2cf   : > { %692 = vbcast.lane.b32.xlu1 %v686_v22, 264  ;;  %688 = vbcast.lane.b32.xlu0 %v686_v22, 256 }
 0x2d3   : > { %696 = vbcast.lane.b32.xlu1 %v686_v22, 272  ;;  %704 = vbcast.lane.b32.xlu0 %v686_v22, 288 }
 0x2d7   : > { %700 = vbcast.lane.b32.xlu1 %v686_v22, 280  ;;  %712 = vbcast.lane.b32.xlu0 %v686_v22, 304 }
 0x2db   : > { %708 = vbcast.lane.b32.xlu1 %v686_v22, 296 }
 0x2df   : > { %716 = vbcast.lane.b32.xlu1 %v686_v22, 312 }
 0x341   : > { %v693_v52 = vpop.permute.xlu1 %692  ;;  %v689_v53 = vpop.permute.xlu0 %688 }
 0x342   : > { %v720_v54 = vmul.f32 %v693_v52, %v1431_v14  ;;  %v721_v55 = vmul.f32 %v693_v52, %v1434_v15  ;;  %v718_v56 = vmul.f32 %v689_v53, %v1399_v2  ;;  %v719_v24 = vmul.f32 %v689_v53, %v1402_v3 }
 0x344   : > { %v736_v57 = vadd.f32 %v720_v54, %v1421_v10  ;;  %v737_v58 = vadd.f32 %v721_v55, %v1428_v13  ;;  %v734_v60 = vadd.f32 %v718_v56, %v1393_v0  ;;  %v735_v61 = vadd.f32 %v719_v24, %v1396_v1 }
 0x345   : > { %v697_v62 = vpop.permute.xlu1 %696  ;;  %v705_v63 = vpop.permute.xlu0 %704 }
 0x346   : > { %752 = vst [vmem:[%s1595_s24 + $0x10] sm:$0xff] %v736_v57  ;;  %753 = vst [vmem:[%s1595_s24 + $0x18] sm:$0xff] %v737_v58  ;;  %v722_v0 = vmul.f32 %v697_v62, %v1415_v8  ;;  %v723_v1 = vmul.f32 %v697_v62, %v1418_v9  ;;  %v726_v2 = vmul.f32 %v705_v63, %v1463_v29 }
 0x347   : > { %750 = vst [vmem:[%s1595_s24] sm:$0xff] %v734_v60  ;;  %751 = vst [vmem:[%s1595_s24 + $0x8] sm:$0xff] %v735_v61  ;;  %v727_v3 = vmul.f32 %v705_v63, %v1466_v30 }
 0x348   : > { %v738_v10 = vadd.f32 %v722_v0, %v1407_v5  ;;  %v739_v13 = vadd.f32 %v723_v1, %v1410_v6  ;;  %v742_v14 = vadd.f32 %v726_v2, %v1455_v25 }
 0x349   : > { %v743_v15 = vadd.f32 %v727_v3, %v1458_v26  ;;  %v701_v4 = vpop.permute.xlu1 %700  ;;  %v713_v7 = vpop.permute.xlu0 %712 }
 0x34a   : > { %754 = vst [vmem:[%s1595_s24 + $0x20] sm:$0xff] %v738_v10  ;;  %755 = vst [vmem:[%s1595_s24 + $0x28] sm:$0xff] %v739_v13  ;;  %v724_v8 = vmul.f32 %v701_v4, %v1447_v21  ;;  %v725_v5 = vmul.f32 %v701_v4, %v1450_v23  ;;  %v730_v6 = vmul.f32 %v713_v7, %v1495_v42 }
 0x34b   : > { %758 = vst [vmem:[%s1595_s24 + $0x40] sm:$0xff] %v742_v14  ;;  %759 = vst [vmem:[%s1595_s24 + $0x48] sm:$0xff] %v743_v15  ;;  %v731_v9 = vmul.f32 %v713_v7, %v1498_v43 }
 0x34c   : > { %v740_v25 = vadd.f32 %v724_v8, %v1441_v19  ;;  %v741_v26 = vadd.f32 %v725_v5, %v1444_v20  ;;  %v746_v29 = vadd.f32 %v730_v6, %v1489_v40 }
 0x34d   : > { %v747_v30 = vadd.f32 %v731_v9, %v1492_v41  ;;  %v709_v11 = vpop.permute.xlu1 %708 }
 0x34e   : > { %756 = vst [vmem:[%s1595_s24 + $0x30] sm:$0xff] %v740_v25  ;;  %757 = vst [vmem:[%s1595_s24 + $0x38] sm:$0xff] %v741_v26  ;;  %v728_v21 = vmul.f32 %v709_v11, %v1479_v35  ;;  %v729_v23 = vmul.f32 %v709_v11, %v1482_v36 }
 0x34f   : > { %762 = vst [vmem:[%s1595_s24 + $0x60] sm:$0xff] %v746_v29  ;;  %763 = vst [vmem:[%s1595_s24 + $0x68] sm:$0xff] %v747_v30 }
 0x350   : > { %v744_v19 = vadd.f32 %v728_v21, %v1469_v31  ;;  %v745_v20 = vadd.f32 %v729_v23, %v1476_v34 }
 0x351   : > { %v717_v40 = vpop.permute.xlu1 %716 }
 0x352   : > { %760 = vst [vmem:[%s1595_s24 + $0x50] sm:$0xff] %v744_v19  ;;  %761 = vst [vmem:[%s1595_s24 + $0x58] sm:$0xff] %v745_v20  ;;  %v732_v41 = vmul.f32 %v717_v40, %v1511_v49  ;;  %v733_v42 = vmul.f32 %v717_v40, %v1514_v50 }
 0x354   : > { %v748_v31 = vadd.f32 %v732_v41, %v1501_v44  ;;  %v749_v34 = vadd.f32 %v733_v42, %v1504_v45 }
 0x356   : > { %764 = vst [vmem:[%s1595_s24 + $0x70] sm:$0xff] %v748_v31  ;;  %765 = vst [vmem:[%s1595_s24 + $0x78] sm:$0xff] %v749_v34 }
 0x357   : > { %1097 = shalt.err (!%p1094_p11)
}
 0x358   : > { %s1098_s19 = scalar_lea.hbm %s1638_s13, 2048  ;;  %s1102_s20 = scalar_lea.hbm %s1696_s8, 4096 }
 0x359   : > { %p1099_p3 = scmp.ne.s32.totalorder %s1638_s13, %s1098_s19  ;;  %p1103_p2 = scmp.lt.u32.totalorder %s1638_s13, %s1696_s8 }
 0x35a   : > { %p1104_p4 = scmp.lt.u32.totalorder %s1102_s20, %s1098_s19  ;;  %p1106_p13 = scmp.lt.u32.totalorder %s1098_s19, %s1638_s13 }
 0x35b   : > { %p1100_p8 = pnand %p1099_p3, %p1717_p1 }
 0x35c   : > { %p1105_p6 = por %p1104_p4, %p1103_p2 }
 0x35d   : > { %p1101_p0 = pneg %p1100_p8 }
 0x35e   : > { %p1107_p12 = por %p1106_p13, %p1105_p6 }
 0x360   : > { %p1108_p10 = pnand %p1107_p12, %p1101_p0 }
 0x362   : > { %1111 = shalt.err (!%p1108_p10)
}
 0x363   : > { %s1164_s25 = smov 256   ;;  %s1165_s14 = smov 16  }
 0x364   : > { %966 = dma.vmem_to_hbm [thread:$0]  (%p1717_p1), %s1640_s0, 2048, %s1638_s13, %s767_s9, %s1164_s25, %s1164_s25, %s1165_s14  }
 0x365 PF: > { %s795_s12 = sand.u32 1, %s1142_s27   ;;  %p1718_p5 = scmp.ne.s32.totalorder %s1709_s18, 0 }
 0x366   : > { %p1719_p7 = scmp.ge.s32.totalorder %s1154_s30, 2  ;;  %s796_s26 = scalar_lea.sflag [#allocation4], %s795_s12 }
 0x368   : > { %p976_p9 = pnand %p1719_p7, %p1718_p5 }
 0x36a   : > { %1137 = dma.done.wait (!%p976_p9), %s796_s26, 2048  }
 0x36b   : > { %1139 = vsyncadd (!%p976_p9), %s796_s26, 4294965248  ;;  %s1720_s10 = sld [smem:[#allocation11_spill]]  ;;  %s1721_s29 = sld [smem:[#allocation12_spill]] }
 0x36c   : > { %p24_p11 = scmp.ge.s32.totalorder %s1236_s11, 4   ;;  %s1722_s27 = smov %s1146_s28 }
 0x36d   : > { %s1724_s30 = smov %s1236_s11 }
 0x36e   :  { %26 = sbr.rel (!%p24_p11) target bundleno = 9 (0x9), region = 110 }
 0x371   : > { %s1723_s28 = smov %s1720_s10 }
 0x375   :  { %801 = vsyncpa [#allocation3], 1 }
 0x376   :  { %803 = vsyncpa [#allocation3 + $0x1], 1 }
 0x377   :  { %804 = vsyncpa [#allocation6], 1 }
 0x378   :  { %806 = vsyncpa [#allocation6 + $0x1], 1 }
 0x379   :  { %807 = vsyncpa [#allocation4], 1 }
 0x37a   :  { %809 = vsyncpa [#allocation4 + $0x1], 1 }

</bundles_post_ra>
